<compile_context>
chip_gen: v6e
topology: v6e:2x2x1
jax: 0.10.0
libtpu: 0.0.40
codegen_flags: <defaults>
</compile_context>

<pallas_src>
import functools

import jax
import jax.numpy as jnp
from jax.experimental import pallas as pl
from jax.experimental.pallas import tpu as pltpu

EPS = 1e-5
LANES = 128
SUBLANES = 8
T_LANE = LANES - 1          # lane of the x/t input slab that carries `t`


def _round_up(n, m):
    return ((n + m - 1) // m) * m


def _bn(h):
    # BatchNorm1d, training-mode batch statistics, gamma=1 / beta=0.
    # Centered temporary reused for the variance and the normalization.
    # Padded (all-zero) columns: mean=0, var=0 -> output stays exactly 0.
    mean = jnp.mean(h, axis=0, keepdims=True)
    c = h - mean
    var = jnp.mean(c * c, axis=0, keepdims=True)
    return c * jax.lax.rsqrt(var + EPS)


def outcome_kernel(xt_ref, p_ref, slab_ref, *, nf, hid, ne, ne_col, t_lane):
    xt = xt_ref[...]                      # (B, 128) f32
    x = xt[:, :nf]                        # real features (padded cols are zero)
    t = xt[:, t_lane:t_lane + 1]          # treatment, (B, 1)

    # Static sublane slices of the packed parameter slab.
    o2 = nf + hid
    o3 = o2 + ne
    w1 = p_ref[0:nf, :]                   # (nf, 128)
    w2 = p_ref[nf:o2, :]                  # (hid, 128)
    w3e = p_ref[o2:o3, :]                 # (ne, 128)
    b1 = p_ref[o3 + 0:o3 + 1, :]
    b2 = p_ref[o3 + 1:o3 + 2, :]
    w3t = p_ref[o3 + 2:o3 + 3, :]
    b3 = p_ref[o3 + 3:o3 + 4, :]
    w4r = p_ref[o3 + 4:o3 + 5, :]
    b4 = p_ref[o3 + 5:o3 + 6, :]          # b4 broadcast across all 128 lanes

    # embed_fc1 -> ReLU -> bn1
    h1 = jnp.dot(x, w1, preferred_element_type=jnp.float32) + b1
    h1 = _bn(jnp.maximum(h1, 0.0))

    # embed_fc2 -> ReLU -> bn2  => embedding (lanes [0, ne_col), zeros elsewhere)
    e = jnp.dot(h1[:, :hid], w2, preferred_element_type=jnp.float32) + b2
    emb = _bn(jnp.maximum(e, 0.0))

    # predict_fc1 on cat([t, emb], -1):
    #   cat([t, emb]) @ W3 == t * W3[:1, :] (VPU broadcast)  +  emb @ W3[1:, :]
    h3 = (t * w3t
          + jnp.dot(emb[:, :ne], w3e, preferred_element_type=jnp.float32)
          + b3)
    h3 = _bn(jnp.maximum(h3, 0.0))        # activation3 -> bn3

    # predict_fc2 (16 -> 1) as a VPU multiply + lane reduction (no N=1 MXU op),
    # then sigmoid.  b4 fills every lane, so every lane of `sig` is the real
    # prediction (the pack below only keeps lane ne_col anyway).
    logit = jnp.sum(h3 * w4r, axis=-1, keepdims=True)     # (B, 1)
    sig = jax.nn.sigmoid(logit + b4)                       # (B, 128)

    # Pack emb (lanes != ne_col) and the prediction (lane == ne_col) into one
    # lane-dense output slab -> single unmasked vst.  Lanes > ne_col carry
    # emb's zeros.
    col = jax.lax.broadcasted_iota(jnp.int32, slab_ref.shape, 1)
    slab_ref[...] = jnp.where(col == ne_col, sig, emb)


def make_outcome_forward(params):
    """Pads/packs all parameters ONCE; returns a jitted forward(x, t)."""
    nf = params["w1"].shape[0]
    hid = params["w1"].shape[1]            # 16
    ne = params["w2"].shape[1]              # n_embedding
    nf8 = _round_up(nf, SUBLANES)
    hid8 = _round_up(hid, SUBLANES)
    ne8 = _round_up(ne, SUBLANES)

    # Slab-packing sanity (embedding + prediction must fit one 128-lane slab,
    # and the feature lanes must not collide with the t lane).
    assert ne + 1 <= LANES, "n_embedding + 1 must fit in one 128-lane slab"
    assert ne < T_LANE and nf8 <= T_LANE and hid <= LANES and ne8 <= LANES

    def blk(a, rows):
        a = jnp.asarray(a, jnp.float32)
        return jnp.pad(a, ((0, rows - a.shape[0]), (0, LANES - a.shape[1])))

    w1 = blk(params["w1"], nf8)             # (nf8, 128)
    w2 = blk(params["w2"], hid8)            # (hid8, 128)
    w3e = blk(params["w3e"], ne8)           # (ne8, 128)
    w4_row = jnp.asarray(params["w4"], jnp.float32)[:, 0][None, :]   # (1, hid)
    b4_val = jnp.asarray(params["b4"], jnp.float32).reshape(())
    rows = jnp.concatenate([
        blk(params["b1"], 1),
        blk(params["b2"], 1),
        blk(params["w3t"], 1),
        blk(params["b3"], 1),
        blk(w4_row, 1),
        jnp.full((1, LANES), b4_val, jnp.float32),
        jnp.zeros((SUBLANES - 6, LANES), jnp.float32),
    ], axis=0)                              # (8, 128)
    pslab = jnp.concatenate([w1, w2, w3e, rows], axis=0)   # (nf8+hid8+ne8+8, 128)

    kernel = functools.partial(
        outcome_kernel, nf=nf8, hid=hid8, ne=ne8, ne_col=ne, t_lane=T_LANE)

    @jax.jit
    def forward(x, t):
        B = x.shape[0]
        # Pack x (lanes [0, n_features)) and t (lane T_LANE) into one
        # lane-dense slab; under jit this fuses with the pallas_call launch.
        xt = jnp.zeros((B, LANES), jnp.float32)
        xt = xt.at[:, :x.shape[1]].set(x.astype(jnp.float32))
        xt = xt.at[:, T_LANE].set(t.astype(jnp.float32).reshape(-1))

        slab = pl.pallas_call(
            kernel,
            in_specs=[pl.BlockSpec(memory_space=pltpu.MemorySpace.VMEM),
                      pl.BlockSpec(memory_space=pltpu.MemorySpace.VMEM)],
            out_specs=pl.BlockSpec(memory_space=pltpu.MemorySpace.VMEM),
            out_shape=jax.ShapeDtypeStruct((B, LANES), jnp.float32),
        )(xt, pslab)

        emb = slab[:, :ne]
        out = slab[:, ne:ne + 1]
        return emb, out

    return forward


def outcome_reference(x, t, params):
    # Pure-JAX reference of the PyTorch MLP branch (training-mode BN).
    h = jnp.dot(x, params["w1"]) + params["b1"]
    h = _bn(jnp.maximum(h, 0.0))
    e = jnp.dot(h, params["w2"]) + params["b2"]
    emb = _bn(jnp.maximum(e, 0.0))
    inp = jnp.concatenate([t, emb], axis=-1)
    w3 = jnp.concatenate([params["w3t"], params["w3e"]], axis=0)
    h3 = jnp.dot(inp, w3) + params["b3"]
    h3 = _bn(jnp.maximum(h3, 0.0))
    logits = jnp.dot(h3, params["w4"]) + params["b4"]
    return emb, jax.nn.sigmoid(logits)


if __name__ == "__main__":
    # small shapes consistent with the module: batch=8, n_features=32, n_embedding=8
    B, n_features, n_embedding = 8, 32, 8

    key = jax.random.PRNGKey(0)
    ks = jax.random.split(key, 10)

    def init(k, shape, scale=0.1):
        return (scale * jax.random.normal(k, shape)).astype(jnp.float32)

    w1 = init(ks[0], (n_features, 16));        b1 = init(ks[1], (1, 16))
    w2 = init(ks[2], (16, n_embedding));       b2 = init(ks[3], (1, n_embedding))
    w3 = init(ks[4], (n_embedding + 1, 16));   b3 = init(ks[5], (1, 16))
    w4 = init(ks[6], (16, 1));                 b4 = init(ks[7], (1, 1))

    params = dict(
        w1=w1, b1=b1, w2=w2, b2=b2,
        w3t=w3[:1, :], w3e=w3[1:, :], b3=b3,
        w4=w4, b4=b4,
    )

    x = jax.random.normal(ks[8], (B, n_features), dtype=jnp.float32)
    t = jax.random.bernoulli(ks[9], 0.5, (B, 1)).astype(jnp.float32)

    forward = make_outcome_forward(params)
    emb, out = forward(x, t)
    jax.block_until_ready((emb, out))

    emb_ref, out_ref = outcome_reference(x, t, params)
    assert emb.shape == (B, n_embedding) and out.shape == (B, 1)
    assert jnp.allclose(emb, emb_ref, atol=1e-4, rtol=1e-4)
    assert jnp.allclose(out, out_ref, atol=1e-4, rtol=1e-4)

    print("KERNEL_OK")
</pallas_src>

<mosaic_0001>
module attributes {stable_mosaic.version = 11 : i64} {
  func.func @outcome_kernel(%arg0: memref<8x128xf32, #tpu.memory_space<vmem>>, %arg1: memref<64x128xf32, #tpu.memory_space<vmem>>, %arg2: memref<8x128xf32, #tpu.memory_space<vmem>>) attributes {dimension_semantics = [], scalar_prefetch = 0 : i64, scratch_operands = 0 : i64, tpu.core_type = #tpu.core_type<tc>} {
    %c0 = arith.constant 0 : index
    %c0_0 = arith.constant 0 : index
    %0 = vector.load %arg0[%c0, %c0_0] : memref<8x128xf32, #tpu.memory_space<vmem>>, vector<8x128xf32>
    %1 = vector.extract_strided_slice %0 {offsets = [0, 0], sizes = [8, 32], strides = [1, 1]} : vector<8x128xf32> to vector<8x32xf32>
    %2 = vector.extract_strided_slice %0 {offsets = [0, 127], sizes = [8, 1], strides = [1, 1]} : vector<8x128xf32> to vector<8x1xf32>
    %c0_1 = arith.constant 0 : index
    %c0_2 = arith.constant 0 : index
    %3 = vector.load %arg1[%c0_1, %c0_2] : memref<64x128xf32, #tpu.memory_space<vmem>>, vector<32x128xf32>
    %c32 = arith.constant 32 : index
    %c0_3 = arith.constant 0 : index
    %4 = vector.load %arg1[%c32, %c0_3] : memref<64x128xf32, #tpu.memory_space<vmem>>, vector<16x128xf32>
    %c48 = arith.constant 48 : index
    %c0_4 = arith.constant 0 : index
    %5 = vector.load %arg1[%c48, %c0_4] : memref<64x128xf32, #tpu.memory_space<vmem>>, vector<8x128xf32>
    %c56 = arith.constant 56 : index
    %c0_5 = arith.constant 0 : index
    %6 = vector.load %arg1[%c56, %c0_5] : memref<64x128xf32, #tpu.memory_space<vmem>>, vector<1x128xf32>
    %c57 = arith.constant 57 : index
    %c0_6 = arith.constant 0 : index
    %7 = vector.load %arg1[%c57, %c0_6] : memref<64x128xf32, #tpu.memory_space<vmem>>, vector<1x128xf32>
    %c58 = arith.constant 58 : index
    %c0_7 = arith.constant 0 : index
    %8 = vector.load %arg1[%c58, %c0_7] : memref<64x128xf32, #tpu.memory_space<vmem>>, vector<1x128xf32>
    %c59 = arith.constant 59 : index
    %c0_8 = arith.constant 0 : index
    %9 = vector.load %arg1[%c59, %c0_8] : memref<64x128xf32, #tpu.memory_space<vmem>>, vector<1x128xf32>
    %c60 = arith.constant 60 : index
    %c0_9 = arith.constant 0 : index
    %10 = vector.load %arg1[%c60, %c0_9] : memref<64x128xf32, #tpu.memory_space<vmem>>, vector<1x128xf32>
    %c61 = arith.constant 61 : index
    %c0_10 = arith.constant 0 : index
    %11 = vector.load %arg1[%c61, %c0_10] : memref<64x128xf32, #tpu.memory_space<vmem>>, vector<1x128xf32>
    %cst = arith.constant dense<0.000000e+00> : vector<8x128xf32>
    %12 = tpu.matmul %1, %3, %cst {dimension_numbers = #tpu.dot_dimension_numbers<[1], [0], [0], [1], [0, 0, 1, 1], [], []>} : vector<8x32xf32>, vector<32x128xf32>, vector<8x128xf32> -> vector<8x128xf32>
    %13 = vector.broadcast %6 : vector<1x128xf32> to vector<8x128xf32>
    %14 = arith.addf %12, %13 : vector<8x128xf32>
    %cst_11 = arith.constant 0.000000e+00 : f32
    %15 = vector.broadcast %cst_11 : f32 to vector<8x128xf32>
    %16 = arith.maximumf %14, %15 : vector<8x128xf32>
    %cst_12 = arith.constant dense<0.000000e+00> : vector<128xf32>
    %17 = vector.multi_reduction <add>, %16, %cst_12 [0] : vector<8x128xf32> to vector<128xf32>
    %18 = vector.shape_cast %17 : vector<128xf32> to vector<1x128xf32>
    %cst_13 = arith.constant 8.000000e+00 : f32
    %19 = vector.broadcast %cst_13 : f32 to vector<1x128xf32>
    %20 = arith.divf %18, %19 : vector<1x128xf32>
    %21 = vector.broadcast %20 : vector<1x128xf32> to vector<8x128xf32>
    %22 = arith.subf %16, %21 : vector<8x128xf32>
    %23 = arith.mulf %22, %22 : vector<8x128xf32>
    %cst_14 = arith.constant dense<0.000000e+00> : vector<128xf32>
    %24 = vector.multi_reduction <add>, %23, %cst_14 [0] : vector<8x128xf32> to vector<128xf32>
    %25 = vector.shape_cast %24 : vector<128xf32> to vector<1x128xf32>
    %cst_15 = arith.constant 8.000000e+00 : f32
    %26 = vector.broadcast %cst_15 : f32 to vector<1x128xf32>
    %27 = arith.divf %25, %26 : vector<1x128xf32>
    %cst_16 = arith.constant 9.99999974E-6 : f32
    %28 = vector.broadcast %cst_16 : f32 to vector<1x128xf32>
    %29 = arith.addf %27, %28 : vector<1x128xf32>
    %30 = math.rsqrt %29 : vector<1x128xf32>
    %31 = vector.broadcast %30 : vector<1x128xf32> to vector<8x128xf32>
    %32 = arith.mulf %22, %31 : vector<8x128xf32>
    %33 = vector.extract_strided_slice %32 {offsets = [0, 0], sizes = [8, 16], strides = [1, 1]} : vector<8x128xf32> to vector<8x16xf32>
    %cst_17 = arith.constant dense<0.000000e+00> : vector<8x128xf32>
    %34 = tpu.matmul %33, %4, %cst_17 {dimension_numbers = #tpu.dot_dimension_numbers<[1], [0], [0], [1], [0, 0, 1, 1], [], []>} : vector<8x16xf32>, vector<16x128xf32>, vector<8x128xf32> -> vector<8x128xf32>
    %35 = vector.broadcast %7 : vector<1x128xf32> to vector<8x128xf32>
    %36 = arith.addf %34, %35 : vector<8x128xf32>
    %cst_18 = arith.constant 0.000000e+00 : f32
    %37 = vector.broadcast %cst_18 : f32 to vector<8x128xf32>
    %38 = arith.maximumf %36, %37 : vector<8x128xf32>
    %cst_19 = arith.constant dense<0.000000e+00> : vector<128xf32>
    %39 = vector.multi_reduction <add>, %38, %cst_19 [0] : vector<8x128xf32> to vector<128xf32>
    %40 = vector.shape_cast %39 : vector<128xf32> to vector<1x128xf32>
    %cst_20 = arith.constant 8.000000e+00 : f32
    %41 = vector.broadcast %cst_20 : f32 to vector<1x128xf32>
    %42 = arith.divf %40, %41 : vector<1x128xf32>
    %43 = vector.broadcast %42 : vector<1x128xf32> to vector<8x128xf32>
    %44 = arith.subf %38, %43 : vector<8x128xf32>
    %45 = arith.mulf %44, %44 : vector<8x128xf32>
    %cst_21 = arith.constant dense<0.000000e+00> : vector<128xf32>
    %46 = vector.multi_reduction <add>, %45, %cst_21 [0] : vector<8x128xf32> to vector<128xf32>
    %47 = vector.shape_cast %46 : vector<128xf32> to vector<1x128xf32>
    %cst_22 = arith.constant 8.000000e+00 : f32
    %48 = vector.broadcast %cst_22 : f32 to vector<1x128xf32>
    %49 = arith.divf %47, %48 : vector<1x128xf32>
    %cst_23 = arith.constant 9.99999974E-6 : f32
    %50 = vector.broadcast %cst_23 : f32 to vector<1x128xf32>
    %51 = arith.addf %49, %50 : vector<1x128xf32>
    %52 = math.rsqrt %51 : vector<1x128xf32>
    %53 = vector.broadcast %52 : vector<1x128xf32> to vector<8x128xf32>
    %54 = arith.mulf %44, %53 : vector<8x128xf32>
    %55 = vector.broadcast %2 : vector<8x1xf32> to vector<8x128xf32>
    %56 = vector.broadcast %8 : vector<1x128xf32> to vector<8x128xf32>
    %57 = arith.mulf %55, %56 : vector<8x128xf32>
    %58 = vector.extract_strided_slice %54 {offsets = [0, 0], sizes = [8, 8], strides = [1, 1]} : vector<8x128xf32> to vector<8x8xf32>
    %cst_24 = arith.constant dense<0.000000e+00> : vector<8x128xf32>
    %59 = tpu.matmul %58, %5, %cst_24 {dimension_numbers = #tpu.dot_dimension_numbers<[1], [0], [0], [1], [0, 0, 1, 1], [], []>} : vector<8x8xf32>, vector<8x128xf32>, vector<8x128xf32> -> vector<8x128xf32>
    %60 = arith.addf %57, %59 : vector<8x128xf32>
    %61 = vector.broadcast %9 : vector<1x128xf32> to vector<8x128xf32>
    %62 = arith.addf %60, %61 : vector<8x128xf32>
    %cst_25 = arith.constant 0.000000e+00 : f32
    %63 = vector.broadcast %cst_25 : f32 to vector<8x128xf32>
    %64 = arith.maximumf %62, %63 : vector<8x128xf32>
    %cst_26 = arith.constant dense<0.000000e+00> : vector<128xf32>
    %65 = vector.multi_reduction <add>, %64, %cst_26 [0] : vector<8x128xf32> to vector<128xf32>
    %66 = vector.shape_cast %65 : vector<128xf32> to vector<1x128xf32>
    %cst_27 = arith.constant 8.000000e+00 : f32
    %67 = vector.broadcast %cst_27 : f32 to vector<1x128xf32>
    %68 = arith.divf %66, %67 : vector<1x128xf32>
    %69 = vector.broadcast %68 : vector<1x128xf32> to vector<8x128xf32>
    %70 = arith.subf %64, %69 : vector<8x128xf32>
    %71 = arith.mulf %70, %70 : vector<8x128xf32>
    %cst_28 = arith.constant dense<0.000000e+00> : vector<128xf32>
    %72 = vector.multi_reduction <add>, %71, %cst_28 [0] : vector<8x128xf32> to vector<128xf32>
    %73 = vector.shape_cast %72 : vector<128xf32> to vector<1x128xf32>
    %cst_29 = arith.constant 8.000000e+00 : f32
    %74 = vector.broadcast %cst_29 : f32 to vector<1x128xf32>
    %75 = arith.divf %73, %74 : vector<1x128xf32>
    %cst_30 = arith.constant 9.99999974E-6 : f32
    %76 = vector.broadcast %cst_30 : f32 to vector<1x128xf32>
    %77 = arith.addf %75, %76 : vector<1x128xf32>
    %78 = math.rsqrt %77 : vector<1x128xf32>
    %79 = vector.broadcast %78 : vector<1x128xf32> to vector<8x128xf32>
    %80 = arith.mulf %70, %79 : vector<8x128xf32>
    %81 = vector.broadcast %10 : vector<1x128xf32> to vector<8x128xf32>
    %82 = arith.mulf %80, %81 : vector<8x128xf32>
    %cst_31 = arith.constant dense<0.000000e+00> : vector<8xf32>
    %83 = vector.multi_reduction <add>, %82, %cst_31 [1] : vector<8x128xf32> to vector<8xf32>
    %84 = vector.shape_cast %83 : vector<8xf32> to vector<8x1xf32>
    %85 = vector.broadcast %84 : vector<8x1xf32> to vector<8x128xf32>
    %86 = vector.broadcast %11 : vector<1x128xf32> to vector<8x128xf32>
    %87 = arith.addf %85, %86 : vector<8x128xf32>
    %88 = arith.negf %87 : vector<8x128xf32>
    %89 = math.exp %88 : vector<8x128xf32>
    %cst_32 = arith.constant 1.000000e+00 : f32
    %90 = vector.broadcast %cst_32 : f32 to vector<8x128xf32>
    %91 = arith.addf %90, %89 : vector<8x128xf32>
    %92 = arith.divf %90, %91 : vector<8x128xf32>
    %93 = tpu.iota {dimensions = array<i32: 1>} : vector<8x128xi32>
    %c8_i32 = arith.constant 8 : i32
    %94 = vector.broadcast %c8_i32 : i32 to vector<8x128xi32>
    %95 = arith.cmpi eq, %93, %94 : vector<8x128xi32>
    %96 = arith.select %95, %92, %54 : vector<8x128xi1>, vector<8x128xf32>
    %c0_33 = arith.constant 0 : index
    %c0_34 = arith.constant 0 : index
    %97 = vector.load %arg2[%c0_33, %c0_34] : memref<8x128xf32, #tpu.memory_space<vmem>>, vector<8x128xf32>
    tpu.vector_store %arg2[%c0_33, %c0_34], %96 {strides = array<i32>} : memref<8x128xf32, #tpu.memory_space<vmem>>, vector<8x128xf32>,
    return
  }
}

</mosaic_0001>

<bundles_post_ra>
// kernel: forward.1
= control target key start
LH: loop header
LB: loop body
LE: loop exit
PB: predicated region body
PF: predicated region fallthrough
CT: control target
= control target key end

     0   :  { %v415_v0 = vmov 0.0   ;;  %vm416_vm0 = vmmov 0   ;;  %vm29_vm1 = vcmask 261120   ;;  %vm128_vm2 = vcmask 130048   ;;  %s481_s1 = inlined_call_operand.vmem [shape: f32[64,128], index: 1, kind: input, shape index: {}]   ;;  %s482_s0 = inlined_call_operand.vmem [shape: f32[8,128], index: 0, kind: input, shape index: {}]   ;;  %s483_s2 = inlined_call_operand.vmem [shape: f32[8,128], index: 2, kind: output, shape index: {}]  }
   0x1   :  { %378 = vmatprep.subr.mxu0 %v415_v0  ;;  %v15_v1 = vld [vmem:[%s481_s1 + $0x18] sm:$0xff]  ;;  %v14_v2 = vld [vmem:[%s481_s1 + $0x10] sm:$0xff]  ;;  %386 = vmatprep.mubr.msk.f32.mxu0 %vm416_vm0, %v415_v0  ;;  %v13_v3 = vld [vmem:[%s481_s1 + $0x8] sm:$0xff]  ;;  %v417_v33 = vmov 127   ;;  %vm231_vm3 = vcmask 64512  }
   0x2   :  { %379 = vmatpush3.msra.mxu0 %v15_v1  ;;  %389 = vmatprep.subr.mxu1 %v415_v0  ;;  %v12_v4 = vld [vmem:[%s481_s1] sm:$0xff]  ;;  %v17_v6 = vld [vmem:[%s481_s1 + $0x28] sm:$0xff]  ;;  %v358_v8 = vld [vmem:[%s481_s1 + $0x38] ss:$0 sm:$0xff] }
   0x3   :  { %380 = vmatprep.subr.mxu0 %v415_v0  ;;  %393 = vmatprep.mubr.msk.f32.mxu1 %vm416_vm0, %v415_v0  ;;  %v11_v5 = vld [vmem:[%s482_s0] sm:$0xff]  ;;  %v18_v32 = vld [vmem:[%s481_s1 + $0x30] sm:$0xff]  ;;  %v360_v34 = vld [vmem:[%s481_s1 + $0x39] ss:$0 sm:$0xff] }
   0x4   :  { %381 = vmatpush3.msra.mxu0 %v14_v2  ;;  %v16_v7 = vld [vmem:[%s481_s1 + $0x20] sm:$0xff]  ;;  %390 = vmatpush3.msra.mxu1 %v17_v6  ;;  %v362_v58 = vld [vmem:[%s481_s1 + $0x3a] ss:$0 sm:$0xff]  ;;  %v364_v61 = vld [vmem:[%s481_s1 + $0x3b] ss:$0 sm:$0xff] }
   0x5   :  { %382 = vmatprep.subr.mxu0 %v415_v0  ;;  %391 = vmatprep.subr.mxu1 %v415_v0 }
   0x6   :  { %383 = vmatpush3.msra.mxu0 %v13_v3  ;;  %392 = vmatpush3.msra.mxu1 %v16_v7 }
   0x7   :  { %384 = vmatprep.subr.mxu0 %v415_v0  ;;  %396 = vmatprep.subr.mxu1 %v415_v0 }
   0x8   :  { %385 = vmatpush3.msra.mxu0 %v12_v4  ;;  %404 = vset.pattern.permute.xlu0 %v417_v33 }
   0x9   :  { %387 = vmatmul.mubr.msk.f32.vlgmr.msra.gmra.mxu0 %vm29_vm1, %v11_v5  ;;  %223 = vperm.xlu0 %404, %v11_v5  }
  0x84   :  { %v224_v59 = vpop.permute.xlu0 %223 }
  0x85   :  { %v230_v60 = vmul.f32 %v362_v58, %v224_v59 }
  0xc9   :  { %v99_v9 = vpop.f32.mrf.mxu0 }
  0xca   :  { %v100_v10 = vadd.f32 %v358_v8, %v99_v9 }
  0xcb   :  { %v388_v11 = vpop.f32.mrf.mxu0 }
  0xcc   :  { %v103_v12 = vmax.f32 %v100_v10, 0.0 }
  0xce   :  { %v104_v13 = vrot.slane %v103_v12, 4 }
  0xd0   :  { %v105_v14 = vadd.f32 %v104_v13, %v103_v12 }
  0xd2   :  { %v106_v15 = vrot.slane %v105_v14, 2 }
  0xd4   :  { %v107_v16 = vadd.f32 %v106_v15, %v105_v14 }
  0xd6   :  { %v108_v17 = vrot.slane %v107_v16, 1 }
  0xd8   :  { %v109_v18 = vadd.f32 %v108_v17, %v107_v16 }
  0xda   :  { %v111_v19 = vmul.f32 0.125, %v109_v18 }
  0xdc   :  { %v112_v20 = vsub.f32 %v103_v12, %v111_v19 }
  0xde   :  { %v113_v21 = vmul.f32 %v112_v20, %v112_v20 }
  0xe0   :  { %v114_v22 = vrot.slane %v113_v21, 4 }
  0xe2   :  { %v115_v23 = vadd.f32 %v114_v22, %v113_v21  ;;  %v365_v21 = vld [vmem:[%s481_s1 + $0x3c] ss:$0 sm:$0xff] }
  0xe4   :  { %v116_v24 = vrot.slane %v115_v23, 2 }
  0xe6   :  { %v117_v25 = vadd.f32 %v116_v24, %v115_v23  ;;  %v366_v24 = vld [vmem:[%s481_s1 + $0x3d] ss:$0 sm:$0xff] }
  0xe8   :  { %v118_v26 = vrot.slane %v117_v25, 1 }
  0xea   :  { %v119_v27 = vadd.f32 %v118_v26, %v117_v25 }
  0xec   :  { %v120_v28 = vmul.f32 0.125, %v119_v27 }
  0xee   :  { %v121_v29 = vadd.f32 1e-05, %v120_v28 }
  0xf0   :  { %405 = vrsqrt.f32 %v121_v29 }
  0xfd   :  { %v406_v30 = vpop.eup %405 }
  0xfe   :  { %v123_v31 = vmul.f32 %v406_v30, %v112_v20  ;;  %v349_v30 = vlaneseq }
 0x100   :  { %394 = vmatmul.mubr.msk.f32.vlgmr.msra.gmra.mxu1 %vm128_vm2, %v123_v31  ;;  %v350_v31 = vand.u32 127, %v349_v30 }
 0x101   :  { %398 = vmatprep.mubr.msk.f32.mxu1 %vm416_vm0, %v415_v0  ;;  %397 = vmatpush3.msra.mxu1 %v18_v32 }
 0x102   :  { %vm351_vm4 = vcmp.eq.s32.totalorder %v350_v31, 8 }
 0x1c0   :  { %v198_v35 = vpop.f32.mrf.mxu1 }
 0x1c1   :  { %v199_v36 = vadd.f32 %v360_v34, %v198_v35 }
 0x1c2   :  { %v395_v37 = vpop.f32.mrf.mxu1 }
 0x1c3   :  { %v202_v38 = vmax.f32 %v199_v36, 0.0 }
 0x1c5   :  { %v203_v39 = vrot.slane %v202_v38, 4 }
 0x1c7   :  { %v204_v40 = vadd.f32 %v203_v39, %v202_v38 }
 0x1c9   :  { %v205_v41 = vrot.slane %v204_v40, 2 }
 0x1cb   :  { %v206_v42 = vadd.f32 %v205_v41, %v204_v40 }
 0x1cd   :  { %v207_v43 = vrot.slane %v206_v42, 1 }
 0x1cf   :  { %v208_v44 = vadd.f32 %v207_v43, %v206_v42 }
 0x1d1   :  { %v209_v45 = vmul.f32 0.125, %v208_v44 }
 0x1d3   :  { %v210_v46 = vsub.f32 %v202_v38, %v209_v45 }
 0x1d5   :  { %v211_v47 = vmul.f32 %v210_v46, %v210_v46 }
 0x1d7   :  { %v212_v48 = vrot.slane %v211_v47, 4 }
 0x1d9   :  { %v213_v49 = vadd.f32 %v212_v48, %v211_v47 }
 0x1db   :  { %v214_v50 = vrot.slane %v213_v49, 2 }
 0x1dd   :  { %v215_v51 = vadd.f32 %v214_v50, %v213_v49 }
 0x1df   :  { %v216_v52 = vrot.slane %v215_v51, 1 }
 0x1e1   :  { %v217_v53 = vadd.f32 %v216_v52, %v215_v51 }
 0x1e3   :  { %v218_v54 = vmul.f32 0.125, %v217_v53 }
 0x1e5   :  { %v219_v55 = vadd.f32 1e-05, %v218_v54 }
 0x1e7   :  { %407 = vrsqrt.f32 %v219_v55 }
 0x1f4   :  { %v408_v56 = vpop.eup %407 }
 0x1f5   :  { %v221_v57 = vmul.f32 %v408_v56, %v210_v46 }
 0x1f7   :  { %399 = vmatmul.mubr.msk.f32.vlgmr.msra.gmra.mxu1 %vm231_vm3, %v221_v57 }
 0x2b7   :  { %v301_v62 = vpop.f32.mrf.mxu1 }
 0x2b8   :  { %v305_v63 = vadd.f32 %v301_v62, %v230_v60 }
 0x2b9   :  { %v400_v0 = vpop.f32.mrf.mxu1 }
 0x2ba   :  { %v310_v1 = vadd.f32 %v364_v61, %v305_v63 }
 0x2bc   :  { %v311_v2 = vmax.f32 %v310_v1, 0.0 }
 0x2be   :  { %v312_v3 = vrot.slane %v311_v2, 4 }
 0x2c0   :  { %v313_v4 = vadd.f32 %v312_v3, %v311_v2 }
 0x2c2   :  { %v314_v5 = vrot.slane %v313_v4, 2 }
 0x2c4   :  { %v315_v6 = vadd.f32 %v314_v5, %v313_v4 }
 0x2c6   :  { %v316_v7 = vrot.slane %v315_v6, 1 }
 0x2c8   :  { %v317_v8 = vadd.f32 %v316_v7, %v315_v6 }
 0x2ca   :  { %v318_v9 = vmul.f32 0.125, %v317_v8 }
 0x2cc   :  { %v319_v10 = vsub.f32 %v311_v2, %v318_v9 }
 0x2ce   :  { %v320_v11 = vmul.f32 %v319_v10, %v319_v10 }
 0x2d0   :  { %v321_v12 = vrot.slane %v320_v11, 4 }
 0x2d2   :  { %v322_v13 = vadd.f32 %v321_v12, %v320_v11 }
 0x2d4   :  { %v323_v14 = vrot.slane %v322_v13, 2 }
 0x2d6   :  { %v324_v15 = vadd.f32 %v323_v14, %v322_v13 }
 0x2d8   :  { %v325_v16 = vrot.slane %v324_v15, 1 }
 0x2da   :  { %v326_v17 = vadd.f32 %v325_v16, %v324_v15 }
 0x2dc   :  { %v327_v18 = vmul.f32 0.125, %v326_v17 }
 0x2de   :  { %v328_v19 = vadd.f32 1e-05, %v327_v18 }
 0x2e0   :  { %409 = vrsqrt.f32 %v328_v19 }
 0x2ed   :  { %v410_v20 = vpop.eup %409 }
 0x2ee   :  { %v330_v22 = vmul.f32 %v410_v20, %v319_v10 }
 0x2f0   :  { %v335_v23 = vmul.f32 %v365_v21, %v330_v22 }
 0x2f2   :  { %336 = vadd.xlane.f32.xlu0 %v335_v23 }
 0x37b   :  { %v337_v25 = vpop.xlane.xlu0 %336 }
 0x37c   :  { %v342_v26 = vadd.f32 %v366_v24, %v337_v25 }
 0x37e   :  { %v367_v27 = vmul.f32 -1.442695, %v342_v26 }
 0x380   :  { %411 = vpow2.f32 %v367_v27 }
 0x38d   :  { %v412_v28 = vpop.eup %411 }
 0x38e   :  { %v346_v29 = vadd.f32 1.0, %v412_v28 }
 0x390   :  { %413 = vrcp.f32 %v346_v29 }
 0x39d   :  { %v414_v32 = vpop.eup %413 }
 0x39e   :  { %v352_v33 = vsel %vm351_vm4, %v414_v32, %v221_v57 }
 0x39f   :  { %353 = vst [vmem:[%s483_s2] sm:$0xff] %v352_v33 }

</bundles_post_ra>
